<compile_context>
chip_gen: v7x
topology: tpu7x:2x2x1
jax: 0.10.0
libtpu: 0.0.40
codegen_flags: <defaults>
</compile_context>

<pallas_src>
import functools

import jax
import jax.numpy as jnp
from jax import lax
from jax.experimental import pallas as pl
from jax.experimental.pallas import tpu as pltpu


def _accuracy_kernel(y_pr_ref, y_gt_ref, out_ref, *, C, H, TH):
    """Per-tile: softmax over C, count exact matches vs one-hot labels.

    y_pr_ref: (1, C, TH, W) logits block (native dtype, cast to f32 in vregs)
    y_gt_ref: (1, 1, TH, W) int32 label block
    out_ref : (1, TH, W)    int32 per-batch-slab partial counts (accumulator)
    """
    h = pl.program_id(1)

    @pl.when(h == 0)
    def _():
        out_ref[...] = jnp.zeros_like(out_ref)

    logits = y_pr_ref[...].astype(jnp.float32)             # (1, C, TH, W)

    # Softmax over the class axis (non-minor -> plain VPU work across vregs).
    m = jnp.max(logits, axis=1, keepdims=True)
    e = jnp.exp(logits - m)
    s = jnp.sum(e, axis=1, keepdims=True)
    probs = e / s   # exact division — required for the exact-equality metric

    labels = y_gt_ref[...]                                  # (1, 1, TH, W) int32
    cls = lax.broadcasted_iota(jnp.int32, logits.shape, 1)  # class ids along C
    is_hot = cls == labels                                  # (1, C, TH, W) bool

    # Exact float equality with the implicit one-hot (1.0 at label, 0.0 else).
    hit = jnp.where(is_hot,
                    (probs == 1.0).astype(jnp.int32),
                    (probs == 0.0).astype(jnp.int32))       # (1, C, TH, W)
    counts = jnp.sum(hit, axis=(0, 1))                      # (TH, W) int32

    if H % TH != 0:
        # Mask rows of the (possibly partial) last H tile.
        row = h * TH + lax.broadcasted_iota(jnp.int32, counts.shape, 0)
        counts = jnp.where(row < H, counts, 0)

    out_ref[...] += counts[None]


def _pick_tile_h(C, H, W, itemsize=4, target_bytes=2 << 20):
    """Pick TH so one logits block is ~2 MiB; multiple of 8 or the full H."""
    th = target_bytes // max(1, C * W * itemsize)
    th = max(8, (int(th) // 8) * 8)
    if th >= H:
        return H
    return th


def accuracy(y_pr, y_gt, class_index=None):
    """Pallas equivalent of Accuracy.forward(y_pr, y_gt).

    y_pr: (N, C, H, W) float logits (NCHW, as in the PyTorch module)
    y_gt: (N, 1, H, W) integer ground-truth class labels
    returns scalar float32 score
    """
    # class_index is stored but never used in the torch forward.
    del class_index

    N, C, H, W = y_pr.shape
    labels = y_gt.astype(jnp.int32)                         # (N, 1, H, W)

    TH = _pick_tile_h(C, H, W, itemsize=4)
    grid_h = pl.cdiv(H, TH)

    kernel = functools.partial(_accuracy_kernel, C=C, H=H, TH=TH)

    counts = pl.pallas_call(
        kernel,
        out_shape=jax.ShapeDtypeStruct((N, TH, W), jnp.int32),
        grid_spec=pltpu.PrefetchScalarGridSpec(
            num_scalar_prefetch=0,
            grid=(N, grid_h),
            in_specs=[
                pl.BlockSpec((1, C, TH, W), lambda n, h: (n, 0, h, 0)),
                pl.BlockSpec((1, 1, TH, W), lambda n, h: (n, 0, h, 0)),
            ],
            out_specs=pl.BlockSpec((1, TH, W), lambda n, h: (n, 0, 0)),
        ),
        compiler_params=pltpu.CompilerParams(
            # N across TensorCores (v7x megacore); H tiles accumulate serially.
            dimension_semantics=("parallel", "arbitrary"),
            # Explicit, conservative budget: fits all generations (v7x = 64 MiB
            # physical); actual use is ~2 double-buffered ~2 MiB blocks.
            vmem_limit_bytes=32 * 1024 * 1024,
        ),
    )(y_pr, labels)

    total = N * C * H * W
    tp = jnp.sum(counts)                                    # exact int32 count
    return (tp.astype(jnp.float32) / jnp.float32(total)).astype(jnp.float32)


def _accuracy_reference(y_pr, y_gt):
    """Plain-JAX reference mirroring the torch forward, for validation."""
    N, C, H, W = y_pr.shape
    one_hot = jax.nn.one_hot(y_gt[:, 0].astype(jnp.int32), C, dtype=jnp.float32)
    one_hot = jnp.transpose(one_hot, (0, 3, 1, 2))          # (N, C, H, W)
    probs = jax.nn.softmax(y_pr.astype(jnp.float32), axis=1)
    tp = jnp.sum((one_hot.reshape(-1) == probs.reshape(-1)).astype(jnp.float32))
    return tp / jnp.float32(one_hot.size)


if __name__ == "__main__":
    key = jax.random.PRNGKey(0)
    k1, k2 = jax.random.split(key)

    N, C, H, W = 2, 4, 16, 16
    # Scale logits so some softmax outputs saturate to exactly 1.0 / 0.0,
    # making the exact-equality count non-trivial.
    y_pr = 30.0 * jax.random.normal(k1, (N, C, H, W), dtype=jnp.float32)
    y_gt = jax.random.randint(k2, (N, 1, H, W), 0, C, dtype=jnp.int32)

    score = accuracy(y_pr, y_gt, class_index=0)
    score = jax.block_until_ready(score)

    ref = jax.block_until_ready(_accuracy_reference(y_pr, y_gt))
    assert abs(float(score) - float(ref)) < 1e-6, (float(score), float(ref))

    print("KERNEL_OK")
</pallas_src>

<mosaic_0001>
module attributes {stable_mosaic.version = 11 : i64} {
  func.func @_accuracy_kernel(%arg0: i32, %arg1: i32, %arg2: memref<1x4x16x16xf32, #tpu.memory_space<vmem>>, %arg3: memref<1x1x16x16xi32, #tpu.memory_space<vmem>>, %arg4: memref<1x16x16xi32, #tpu.memory_space<vmem>>) attributes {dimension_semantics = [#tpu.dimension_semantics<parallel>, #tpu.dimension_semantics<arbitrary>], iteration_bounds = array<i64: 2, 1>, scalar_prefetch = 0 : i64, scratch_operands = 0 : i64, tpu.core_type = #tpu.core_type<tc>, window_params = [{transform_indices = @transform_0, window_bounds = array<i64: 1, 4, 16, 16>}, {transform_indices = @transform_1, window_bounds = array<i64: 1, 1, 16, 16>}, {transform_indices = @transform_2, window_bounds = array<i64: 1, 16, 16>}]} {
    %c0_i32 = arith.constant 0 : i32
    %0 = arith.cmpi eq, %arg1, %c0_i32 : i32
    %1 = arith.extui %0 : i1 to i32
    %c0_i32_0 = arith.constant 0 : i32
    %2 = arith.cmpi ne, %1, %c0_i32_0 : i32
    scf.if %2 {
      %c0_i32_18 = arith.constant 0 : i32
      %29 = vector.broadcast %c0_i32_18 : i32 to vector<1x16x16xi32>
      %c0_19 = arith.constant 0 : index
      %c0_20 = arith.constant 0 : index
      %c0_21 = arith.constant 0 : index
      %30 = vector.load %arg4[%c0_19, %c0_20, %c0_21] : memref<1x16x16xi32, #tpu.memory_space<vmem>>, vector<1x16x16xi32>
      tpu.vector_store %arg4[%c0_19, %c0_20, %c0_21], %29 {strides = array<i32>} : memref<1x16x16xi32, #tpu.memory_space<vmem>>, vector<1x16x16xi32>,
    } else {
    }
    %c0 = arith.constant 0 : index
    %c0_1 = arith.constant 0 : index
    %c0_2 = arith.constant 0 : index
    %c0_3 = arith.constant 0 : index
    %3 = vector.load %arg2[%c0, %c0_1, %c0_2, %c0_3] : memref<1x4x16x16xf32, #tpu.memory_space<vmem>>, vector<1x4x16x16xf32>
    %cst = arith.constant dense<0xFF800000> : vector<1x16x16xf32>
    %4 = vector.multi_reduction <maximumf>, %3, %cst [1] : vector<1x4x16x16xf32> to vector<1x16x16xf32>
    %5 = vector.shape_cast %4 : vector<1x16x16xf32> to vector<1x1x16x16xf32>
    %6 = vector.broadcast %5 : vector<1x1x16x16xf32> to vector<1x4x16x16xf32>
    %7 = arith.subf %3, %6 : vector<1x4x16x16xf32>
    %8 = math.exp %7 : vector<1x4x16x16xf32>
    %cst_4 = arith.constant dense<0.000000e+00> : vector<1x16x16xf32>
    %9 = vector.multi_reduction <add>, %8, %cst_4 [1] : vector<1x4x16x16xf32> to vector<1x16x16xf32>
    %10 = vector.shape_cast %9 : vector<1x16x16xf32> to vector<1x1x16x16xf32>
    %11 = vector.broadcast %10 : vector<1x1x16x16xf32> to vector<1x4x16x16xf32>
    %12 = arith.divf %8, %11 : vector<1x4x16x16xf32>
    %c0_5 = arith.constant 0 : index
    %c0_6 = arith.constant 0 : index
    %c0_7 = arith.constant 0 : index
    %c0_8 = arith.constant 0 : index
    %13 = vector.load %arg3[%c0_5, %c0_6, %c0_7, %c0_8] : memref<1x1x16x16xi32, #tpu.memory_space<vmem>>, vector<1x1x16x16xi32>
    %14 = tpu.iota {dimensions = array<i32: 1>} : vector<1x4x16x16xi32>
    %15 = vector.broadcast %13 : vector<1x1x16x16xi32> to vector<1x4x16x16xi32>
    %16 = arith.cmpi eq, %14, %15 : vector<1x4x16x16xi32>
    %cst_9 = arith.constant 1.000000e+00 : f32
    %17 = vector.broadcast %cst_9 : f32 to vector<1x4x16x16xf32>
    %18 = arith.cmpf oeq, %12, %17 : vector<1x4x16x16xf32>
    %19 = arith.extui %18 : vector<1x4x16x16xi1> to vector<1x4x16x16xi32>
    %cst_10 = arith.constant 0.000000e+00 : f32
    %20 = vector.broadcast %cst_10 : f32 to vector<1x4x16x16xf32>
    %21 = arith.cmpf oeq, %12, %20 : vector<1x4x16x16xf32>
    %22 = arith.extui %21 : vector<1x4x16x16xi1> to vector<1x4x16x16xi32>
    %23 = arith.select %16, %19, %22 : vector<1x4x16x16xi1>, vector<1x4x16x16xi32>
    %cst_11 = arith.constant dense<0> : vector<16x16xi32>
    %24 = vector.multi_reduction <add>, %23, %cst_11 [0, 1] : vector<1x4x16x16xi32> to vector<16x16xi32>
    %c0_12 = arith.constant 0 : index
    %c0_13 = arith.constant 0 : index
    %c0_14 = arith.constant 0 : index
    %25 = vector.load %arg4[%c0_12, %c0_13, %c0_14] : memref<1x16x16xi32, #tpu.memory_space<vmem>>, vector<1x16x16xi32>
    %26 = vector.shape_cast %24 : vector<16x16xi32> to vector<1x16x16xi32>
    %27 = arith.addi %25, %26 : vector<1x16x16xi32>
    %c0_15 = arith.constant 0 : index
    %c0_16 = arith.constant 0 : index
    %c0_17 = arith.constant 0 : index
    %28 = vector.load %arg4[%c0_15, %c0_16, %c0_17] : memref<1x16x16xi32, #tpu.memory_space<vmem>>, vector<1x16x16xi32>
    tpu.vector_store %arg4[%c0_15, %c0_16, %c0_17], %27 {strides = array<i32>} : memref<1x16x16xi32, #tpu.memory_space<vmem>>, vector<1x16x16xi32>,
    return
  }
  func.func @transform_0(%arg0: i32, %arg1: i32) -> (i32, i32, i32, i32) {
    %c0_i32 = arith.constant 0 : i32
    %c0_i32_0 = arith.constant 0 : i32
    %c0_i32_1 = arith.constant 0 : i32
    return %arg0, %c0_i32, %arg1, %c0_i32_0 : i32, i32, i32, i32
  }
  func.func @transform_1(%arg0: i32, %arg1: i32) -> (i32, i32, i32, i32) {
    %c0_i32 = arith.constant 0 : i32
    %c0_i32_0 = arith.constant 0 : i32
    %c0_i32_1 = arith.constant 0 : i32
    return %arg0, %c0_i32, %arg1, %c0_i32_0 : i32, i32, i32, i32
  }
  func.func @transform_2(%arg0: i32, %arg1: i32) -> (i32, i32, i32) {
    %c0_i32 = arith.constant 0 : i32
    %c0_i32_0 = arith.constant 0 : i32
    %c0_i32_1 = arith.constant 0 : i32
    return %arg0, %c0_i32, %c0_i32_0 : i32, i32, i32
  }
}

</mosaic_0001>

<bundles_post_ra>
// kernel: tpu_custom_call.1
= control target key start
LH: loop header
LB: loop body
LE: loop exit
PB: predicated region body
PF: predicated region fallthrough
CT: control target
= control target key end

     0   :  { %7 = vsyncpa [#allocation3], 0  ;;  %s1089_s0 = inlined_call_operand.hbm [shape: f32[2,4,16,16], index: 0, kind: input, shape index: {}]   ;;  %s1090_s1 = inlined_call_operand.hbm [shape: s32[2,1,16,16], index: 1, kind: input, shape index: {}]   ;;  %s1091_s2 = inlined_call_operand.hbm [shape: s32[2,16,16], index: 2, kind: output, shape index: {}]  }
   0x1   :  { %9 = vsyncpa [#allocation3 + $0x1], 0 }
   0x2   :  { %10 = vsyncpa [#allocation6], 0 }
   0x3   :  { %12 = vsyncpa [#allocation6 + $0x1], 0 }
   0x4   :  { %13 = vsyncpa [#allocation4], 0 }
   0x5   :  { %15 = vsyncpa [#allocation4 + $0x1], 0  ;;  %s781_s9 = smov 0   ;;  %s783_s10 = smov 0  }
   0x6   :  { %s785_s11 = smov 0   ;;  %s787_s12 = smov 0  }
   0x7   :  { %s789_s13 = smov 0   ;;  %s791_s14 = smov 0  }
   0x8 LB: > { %s496_s15 = sadd.s32 4294967295, %s756_s14   ;;  %s497_s16 = sadd.s32 4294967294, %s756_s14   ;;  %s756_s14 = sphi %s791_s14, %s21_s14   ;;  %s752_s13 = sphi %s789_s13, %s1109_s13   ;;  %s748_s12 = sphi %s787_s12, %s1108_s12   ;;  %s744_s11 = sphi %s785_s11, %s1107_s11   ;;  %s740_s10 = sphi %s783_s10, %s1106_s10   ;;  %s736_s9 = sphi %s781_s9, %s1105_s9  }
   0x9   : > { %s33_s17 = sadd.s32 1, %s752_s13  ;;  %s42_s18 = sadd.s32 1, %s744_s11 }
   0xa   : > { %p35_p0 = scmp.ge.s32.totalorder %s33_s17, 2  ;;  %p49_p1 = scmp.ne.s32.totalorder %s744_s11, %s740_s10 }
   0xb   : > { %p50_p2 = scmp.eq.s32.totalorder %s756_s14, 0  ;;  %p55_p3 = scmp.ne.s32.totalorder %s740_s10, %s736_s9 }
   0xc   : > { %s1111_s17 = smov (%p35_p0, %s33_s17), 0  ;;  %p56_p5 = scmp.eq.s32.totalorder %s496_s15, 0 }
   0xd   : > { %p822_p4 = por %p50_p2, %p49_p1  ;;  %s37_s20 = ssub.s32 %s752_s13, %s1111_s17 }
   0xe   : > { %p107_p6 = scmp.eq.s32.totalorder %s496_s15, 1  ;;  %p40_p7 = scmp.eq.s32.totalorder %s37_s20, 0 }
   0xf   : > { %p828_p8 = por %p56_p5, %p55_p3  ;;  %p113_p10 = scmp.eq.s32.totalorder %s497_s16, 1 }
  0x10   : > { %p832_p9 = por %p107_p6, %p49_p1  ;;  %p535_p13 = scmp.lt.s32.totalorder %s756_s14, 2 }
  0x11   : > { %s1095_s21 = scalar_select %p828_p8, 1, 0 }
  0x12   : > { %s1096_s22 = scalar_select %p832_p9, 1, 0 }
  0x13   : > { %s837_s23 = scalar_select %p40_p7, %s744_s11, %s42_s18  }
  0x14   : > { %p839_p11 = por %p113_p10, %p55_p3  ;;  %s846_s25 = sand.u32 1, %s744_s11  }
  0x15   : > { %s500_s26 = sshll.u32 %s846_s25, 6  ;;  %s515_s27 = sshll.u32 %s752_s13, 10 }
  0x16   : > { %s1097_s24 = scalar_select %p839_p11, 1, 0 }
  0x17   : > { %s853_s30 = scalar_lea.hbm %s1089_s0, %s515_s27  ;;  %s137_s3 = scalar_lea.vmem [#allocation2], %s500_s26 }
  0x18   : > { %s146_s4 = sshll.u32 %s137_s3, 4  ;;  %p859_p0 = pnand %p535_p13, %p822_p4  ;;  %s855_s4 = int_to_ptr.vmem [resolvable:$true] %s146_s4 }
  0x19   : > { %s134_s6 = scalar_lea.sflag [#allocation3], %s846_s25  ;;  %s610_s7 = scalar_lea.hbm %s853_s30, 1024 }
  0x1a   : > { %p611_p2 = scmp.ne.s32.totalorder %s853_s30, %s610_s7  ;;  %p612_p3 = pneg %p859_p0 }
  0x1b   : > { %s615_s16 = scalar_lea.hbm %s1089_s0, 2048  ;;  %p616_p4 = scmp.lt.u32.totalorder %s853_s30, %s1089_s0 }
  0x1c   : > { %p613_p5 = pnand %p612_p3, %p611_p2  ;;  %p617_p7 = scmp.lt.u32.totalorder %s615_s16, %s610_s7 }
  0x1d   : > { %p619_p13 = scmp.lt.u32.totalorder %s610_s7, %s853_s30 }
  0x1e   : > { %p614_p6 = pneg %p613_p5  ;;  %p618_p10 = por %p617_p7, %p616_p4 }
  0x20   : > { %p620_p12 = por %p619_p13, %p618_p10 }
  0x22   : > { %p621_p1 = pnand %p620_p12, %p614_p6 }
  0x24   : > { %624 = shalt.err (!%p621_p1)
}
  0x25   : > { %s625_s20 = scalar_lea.vmem %s855_s4, 1024  ;;  %s758_s26 = smov [#allocation2]  }
  0x26   : > { %p626_p2 = scmp.ne.s32.totalorder %s855_s4, %s625_s20  ;;  %s630_s27 = sshll.u32 %s758_s26, 4  ;;  %s631_s27 = int_to_ptr.vmem [resolvable:$false] %s630_s27 }
  0x27   : > { %s632_s28 = scalar_lea.vmem %s631_s27, 2048  ;;  %p633_p9 = scmp.lt.s32.totalorder %s855_s4, %s631_s27 }
  0x28   : > { %p628_p5 = pnand %p626_p2, %p612_p3  ;;  %p634_p4 = scmp.lt.s32.totalorder %s632_s28, %s625_s20 }
  0x2a   : > { %p629_p11 = pneg %p628_p5  ;;  %p635_p7 = por %p634_p4, %p633_p9 }
  0x2c   : > { %p636_p10 = pnand %p635_p7, %p629_p11 }
  0x2e   : > { %639 = shalt.err (!%p636_p10)
}
  0x2f   : > { %s759_s29 = smov 128   ;;  %s760_s3 = smov 8  }
  0x30   : > { %527 = dma.hbm_to_vmem [thread:$0]  (!%p859_p0), %s853_s30, 1024, %s855_s4, %s134_s6, %s759_s29, %s759_s29, %s760_s3  }
  0x31   : > { %p177_p9 = scmp.lt.s32.totalorder %s756_s14, 3  ;;  %s503_s7 = sshll.u32 %s846_s25, 4 }
  0x32   : > { %s516_s8 = sshll.u32 %s752_s13, 8  ;;  %p1099_p11 = scmp.ge.s32.totalorder %s756_s14, 1 }
  0x33   : > { %s907_s19 = scalar_lea.hbm %s1090_s1, %s516_s8  ;;  %s160_s20 = scalar_lea.vmem [#allocation5], %s503_s7 }
  0x34   : > { %p900_p12 = pnand %p1099_p11, %p177_p9  ;;  %s169_s26 = sshll.u32 %s160_s20, 4  ;;  %s909_s26 = int_to_ptr.vmem [resolvable:$true] %s169_s26 }
  0x35   : > { %s157_s30 = scalar_lea.sflag [#allocation6], %s846_s25  ;;  %s640_s4 = scalar_lea.hbm %s907_s19, 256 }
  0x36   : > { %p641_p1 = scmp.ne.s32.totalorder %s907_s19, %s640_s4  ;;  %s645_s28 = scalar_lea.hbm %s1090_s1, 512 }
  0x37   : > { %p646_p2 = scmp.lt.u32.totalorder %s907_s19, %s1090_s1  ;;  %p647_p5 = scmp.lt.u32.totalorder %s645_s28, %s640_s4 }
  0x38   : > { %p643_p6 = pnand %p641_p1, %p612_p3  ;;  %p649_p7 = scmp.lt.u32.totalorder %s640_s4, %s907_s19 }
  0x39   : > { %p648_p4 = por %p647_p5, %p646_p2 }
  0x3a   : > { %p644_p13 = pneg %p643_p6 }
  0x3b   : > { %p650_p10 = por %p649_p7, %p648_p4 }
  0x3d   : > { %p651_p9 = pnand %p650_p10, %p644_p13 }
  0x3f   : > { %654 = shalt.err (!%p651_p9)
}
  0x40   : > { %s655_s7 = scalar_lea.vmem %s909_s26, 256  ;;  %s761_s18 = smov [#allocation5]  }
  0x41   : > { %p656_p11 = scmp.ne.s32.totalorder %s909_s26, %s655_s7  ;;  %s660_s20 = sshll.u32 %s761_s18, 4  ;;  %s661_s20 = int_to_ptr.vmem [resolvable:$false] %s660_s20 }
  0x42   : > { %s662_s6 = scalar_lea.vmem %s661_s20, 512  ;;  %p663_p8 = scmp.lt.s32.totalorder %s909_s26, %s661_s20 }
  0x43   : > { %p658_p1 = pnand %p656_p11, %p612_p3  ;;  %p664_p2 = scmp.lt.s32.totalorder %s662_s6, %s655_s7 }
  0x45   : > { %p659_p6 = pneg %p658_p1  ;;  %p665_p5 = por %p664_p2, %p663_p8 }
  0x47   : > { %p666_p4 = pnand %p665_p5, %p659_p6 }
  0x49   : > { %669 = shalt.err (!%p666_p4)
}
  0x4a   : > { %530 = dma.hbm_to_vmem [thread:$0]  (!%p859_p0), %s907_s19, 256, %s909_s26, %s157_s30, %s759_s29, %s759_s29, %s760_s3  }
  0x4b   : > { %181 = sbr.rel (%p900_p12) target bundleno = 165 (0xa5), region = 28  ;;  %s943_s4 = sand.u32 (!%p900_p12), 1, %s740_s10  }
  0x4c   : > { %s507_s27 = sshll.u32 (!%p900_p12), %s943_s4, 6  ;;  %s184_s28 = scalar_lea.sflag (!%p900_p12), [#allocation3], %s943_s4 }
  0x4d   : > { %s187_s5 = scalar_lea.vmem (!%p900_p12), [#allocation2], %s507_s27  ;;  %p1101_p8 = scmp.ne.s32.totalorder (!%p900_p12), %s1095_s21, 0 }
  0x52   : > { %723 = dma.done.wait (%p1101_p8), %s184_s28, 1024  }
  0x53   : > { %725 = vsyncadd (%p1101_p8), %s184_s28, 4294966272  ;;  %s508_s25 = sshll.u32 %s943_s4, 4  ;;  %s193_s29 = scalar_lea.sflag [#allocation6], %s943_s4 }
  0x54   : > { %s953_s3 = scalar_lea.vmem [#allocation5], %s508_s25 }
  0x55   : > { %727 = dma.done.wait (%p1101_p8), %s193_s29, 256  }
  0x56   : > { %729 = vsyncadd (%p1101_p8), %s193_s29, 4294967040  ;;  %vm228_vm0 = vcmask 130048   ;;  %s959_s15 = scalar_lea.vmem [#allocation7], %s508_s25  ;;  %v762_v0 = vmov 0   ;;  %v231_v1 = vld [vmem:[%s187_s5] sm:$0xff]  ;;  %v233_v2 = vld [vmem:[%s187_s5 + $0x10] sm:$0xff] }
  0x57   : > { %229 = vst.msk [vmem:[%s959_s15] sm:$0xff] %vm228_vm0, %v762_v0  ;;  %230 = vst.msk [vmem:[%s959_s15 + $0x8] sm:$0xff] %vm228_vm0, %v762_v0  ;;  %v235_v3 = vld [vmem:[%s187_s5 + $0x20] sm:$0xff]  ;;  %v237_v4 = vld [vmem:[%s187_s5 + $0x30] sm:$0xff]  ;;  %v240_v5 = vsel %vm228_vm0, %v231_v1, -inf  ;;  %v241_v6 = vsel %vm228_vm0, %v233_v2, -inf }
  0x58   : > { %v242_v7 = vsel %vm228_vm0, %v235_v3, -inf  ;;  %v244_v9 = vsel %vm228_vm0, %v237_v4, -inf  ;;  %v232_v10 = vld [vmem:[%s187_s5 + $0x8] sm:$0xff]  ;;  %v234_v11 = vld [vmem:[%s187_s5 + $0x18] sm:$0xff]  ;;  %v302_v61 = vld [vmem:[%s953_s3] sm:$0xff]  ;;  %s517_s21 = sshll.u32 %s748_s12, 8 }
  0x59   : > { %v243_v8 = vmax.f32 %v240_v5, %v242_v7  ;;  %v236_v12 = vld [vmem:[%s187_s5 + $0x28] sm:$0xff]  ;;  %v245_v13 = vmax.f32 %v241_v6, %v244_v9  ;;  %v238_v14 = vld [vmem:[%s187_s5 + $0x38] sm:$0xff]  ;;  %v247_v15 = vsel %vm228_vm0, %v232_v10, -inf  ;;  %v248_v16 = vsel %vm228_vm0, %v234_v11, -inf  ;;  %s386_s19 = sshll.u32 %s959_s15, 4  ;;  %s1036_s8 = scalar_lea.hbm %s1091_s2, %s517_s21  ;;  %s1038_s19 = int_to_ptr.vmem [resolvable:$true] %s386_s19 }
  0x5a   : > { %v249_v17 = vsel %vm228_vm0, %v236_v12, -inf  ;;  %v251_v18 = vsel %vm228_vm0, %v238_v14, -inf  ;;  %vm304_vm1 = vcmp.eq.s32.totalorder %v302_v61, 0  ;;  %vm306_vm2 = vcmp.eq.s32.totalorder %v302_v61, 1  ;;  %s373_s16 = scalar_lea.sflag [#allocation4], %s943_s4  ;;  %s670_s7 = scalar_lea.vmem %s1038_s19, 256 }
  0x5b   : > { %v246_v19 = vmax.f32 %v243_v8, %v245_v13  ;;  %v250_v20 = vmax.f32 %v247_v15, %v249_v17  ;;  %v252_v21 = vmax.f32 %v248_v16, %v251_v18  ;;  %vm308_vm3 = vcmp.eq.s32.totalorder %v302_v61, 2  ;;  %p671_p0 = scmp.ne.s32.totalorder %s1038_s19, %s670_s7  ;;  %p1102_p3 = scmp.ne.s32.totalorder %s1096_s22, 0 }
  0x5c   : > { %vm310_vm4 = vcmp.eq.s32.totalorder %v302_v61, 3  ;;  %s763_s12 = smov [#allocation7]  }
  0x5d   : > { %v254_v22 = vsub.f32 %v231_v1, %v246_v19  ;;  %v256_v23 = vsub.f32 %v233_v2, %v246_v19  ;;  %v258_v24 = vsub.f32 %v235_v3, %v246_v19  ;;  %v260_v25 = vsub.f32 %v237_v4, %v246_v19  ;;  %v985_v4 = vld [vmem:[%s953_s3 + $0x8] sm:$0xff]  ;;  %p672_p12 = pnand %p671_p0, %p1102_p3  ;;  %s674_s18 = sshll.u32 %s763_s12, 4  ;;  %s675_s18 = int_to_ptr.vmem [resolvable:$false] %s674_s18 }
  0x5e   : > { %v253_v26 = vmax.f32 %v250_v20, %v252_v21  ;;  %vm305_vm9 = vcmp.eq.s32.totalorder %v985_v4, 0  ;;  %vm307_vm10 = vcmp.eq.s32.totalorder %v985_v4, 1  ;;  %vm309_vm15 = vcmp.eq.s32.totalorder %v985_v4, 2  ;;  %s676_s20 = scalar_lea.vmem %s675_s18, 512  ;;  %p677_p7 = scmp.lt.s32.totalorder %s1038_s19, %s675_s18 }
  0x5f   : > { %v262_v27 = vmul.f32 1.442695, %v254_v22  ;;  %v266_v28 = vmul.f32 1.442695, %v256_v23  ;;  %v270_v29 = vmul.f32 1.442695, %v258_v24  ;;  %p673_p13 = pneg %p672_p12  ;;  %p678_p10 = scmp.lt.s32.totalorder %s676_s20, %s670_s7 }
  0x60   : > { %v274_v30 = vmul.f32 1.442695, %v260_v25  ;;  %v255_v31 = vsub.f32 %v232_v10, %v253_v26  ;;  %v257_v32 = vsub.f32 %v234_v11, %v253_v26  ;;  %v259_v33 = vsub.f32 %v236_v12, %v253_v26 }
  0x61   : > { %590 = vpow2.f32 %v262_v27  ;;  %v261_v34 = vsub.f32 %v238_v14, %v253_v26  ;;  %v366_v26 = vld [vmem:[%s959_s15] sm:$0xff]  ;;  %p679_p9 = por %p678_p10, %p677_p7 }
  0x62   : > { %592 = vpow2.f32 %v266_v28  ;;  %v264_v35 = vmul.f32 1.442695, %v255_v31  ;;  %v268_v36 = vmul.f32 1.442695, %v257_v32  ;;  %v272_v37 = vmul.f32 1.442695, %v259_v33 }
  0x63   : > { %594 = vpow2.f32 %v270_v29  ;;  %v276_v38 = vmul.f32 1.442695, %v261_v34  ;;  %p680_p11 = pnand %p679_p9, %p673_p13 }
  0x64   : > { %596 = vpow2.f32 %v274_v30 }
  0x65   : > { %598 = vpow2.f32 %v264_v35 }
  0x66   : > { %600 = vpow2.f32 %v268_v36 }
  0x67   : > { %602 = vpow2.f32 %v272_v37 }
  0x68   : > { %604 = vpow2.f32 %v276_v38 }
  0x6b   : > { %v591_v39 = vpop.eup %590 }
  0x6c   : > { %v593_v40 = vpop.eup %592  ;;  %v278_v41 = vsel %vm228_vm0, %v591_v39, 0.0 }
  0x6d   : > { %v595_v42 = vpop.eup %594  ;;  %v279_v43 = vsel %vm228_vm0, %v593_v40, 0.0 }
  0x6e   : > { %v597_v44 = vpop.eup %596  ;;  %v280_v45 = vadd.f32 %v279_v43, %v278_v41  ;;  %v281_v46 = vsel %vm228_vm0, %v595_v42, 0.0 }
  0x6f   : > { %v599_v47 = vpop.eup %598  ;;  %v283_v48 = vsel %vm228_vm0, %v597_v44, 0.0 }
  0x70   : > { %v601_v49 = vpop.eup %600  ;;  %v282_v50 = vadd.f32 %v281_v46, %v280_v45  ;;  %v285_v51 = vsel %vm228_vm0, %v599_v47, 0.0 }
  0x71   : > { %v603_v52 = vpop.eup %602  ;;  %v286_v53 = vsel %vm228_vm0, %v601_v49, 0.0 }
  0x72   : > { %v605_v54 = vpop.eup %604  ;;  %v284_v55 = vadd.f32 %v283_v48, %v282_v50  ;;  %v287_v56 = vadd.f32 %v286_v53, %v285_v51  ;;  %v288_v57 = vsel %vm228_vm0, %v603_v52, 0.0  ;;  %v367_v48 = vld [vmem:[%s959_s15 + $0x8] sm:$0xff] }
  0x73   : > { %v290_v58 = vsel %vm228_vm0, %v605_v54, 0.0 }
  0x74   : > { %606 = vrcp.f32 %v284_v55  ;;  %v289_v59 = vadd.f32 %v288_v57, %v287_v56 }
  0x76   : > { %v291_v60 = vadd.f32 %v290_v58, %v289_v59 }
  0x78   : > { %608 = vrcp.f32 %v291_v60 }
  0x7e   : > { %v607_v62 = vpop.eup %606 }
  0x7f   : > { %v293_v63 = vmul.f32 %v607_v62, %v591_v39  ;;  %v296_v1 = vmul.f32 %v607_v62, %v593_v40  ;;  %v298_v2 = vmul.f32 %v607_v62, %v595_v42  ;;  %v300_v3 = vmul.f32 %v607_v62, %v597_v44 }
  0x81   : > { %vm312_vm5 = vcmp.eq.f32.partialorder %v293_v63, 1.0  ;;  %vm314_vm6 = vcmp.eq.f32.partialorder %v296_v1, 1.0  ;;  %vm316_vm7 = vcmp.eq.f32.partialorder %v298_v2, 1.0  ;;  %vm318_vm8 = vcmp.eq.f32.partialorder %v300_v3, 1.0 }
  0x82   : > { %v320_v5 = vsel %vm312_vm5, 1, %v762_v0  ;;  %v322_v6 = vsel %vm314_vm6, 1, %v762_v0  ;;  %v324_v7 = vsel %vm316_vm7, 1, %v762_v0  ;;  %v326_v8 = vsel %vm318_vm8, 1, %v762_v0  ;;  %v609_v9 = vpop.eup %608 }
  0x83   : > { %vm328_vm11 = vcmp.eq.f32.partialorder %v293_v63, 0.0  ;;  %vm330_vm12 = vcmp.eq.f32.partialorder %v296_v1, 0.0  ;;  %vm332_vm13 = vcmp.eq.f32.partialorder %v298_v2, 0.0  ;;  %vm334_vm14 = vcmp.eq.f32.partialorder %v300_v3, 0.0 }
  0x84   : > { %v336_v10 = vsel %vm328_vm11, 1, %v762_v0  ;;  %v338_v11 = vsel %vm330_vm12, 1, %v762_v0  ;;  %v340_v12 = vsel %vm332_vm13, 1, %v762_v0  ;;  %v342_v13 = vsel %vm334_vm14, 1, %v762_v0 }
  0x85   : > { %v344_v14 = vsel %vm304_vm1, %v320_v5, %v336_v10  ;;  %v346_v15 = vsel %vm306_vm2, %v322_v6, %v338_v11  ;;  %v348_v16 = vsel %vm308_vm3, %v324_v7, %v340_v12  ;;  %v350_v17 = vsel %vm310_vm4, %v326_v8, %v342_v13 }
  0x86   : > { %v352_v18 = vsel %vm228_vm0, %v344_v14, 0  ;;  %v353_v19 = vsel %vm228_vm0, %v346_v15, 0  ;;  %v354_v20 = vsel %vm228_vm0, %v348_v16, 0  ;;  %v356_v21 = vsel %vm228_vm0, %v350_v17, 0 }
  0x87   : > { %v355_v22 = vadd.s32 %v354_v20, %v352_v18  ;;  %v357_v23 = vadd.s32 %v356_v21, %v353_v19  ;;  %v295_v24 = vmul.f32 %v609_v9, %v599_v47  ;;  %v297_v25 = vmul.f32 %v609_v9, %v601_v49 }
  0x88   : > { %v299_v27 = vmul.f32 %v609_v9, %v603_v52  ;;  %v301_v28 = vmul.f32 %v609_v9, %v605_v54  ;;  %vm311_vm1 = vcmp.eq.s32.totalorder %v985_v4, 3 }
  0x89   : > { %v358_v29 = vadd.s32 %v357_v23, %v355_v22  ;;  %vm313_vm2 = vcmp.eq.f32.partialorder %v295_v24, 1.0  ;;  %vm315_vm3 = vcmp.eq.f32.partialorder %v297_v25, 1.0  ;;  %vm329_vm4 = vcmp.eq.f32.partialorder %v295_v24, 0.0 }
  0x8a   : > { %vm317_vm5 = vcmp.eq.f32.partialorder %v299_v27, 1.0  ;;  %vm319_vm6 = vcmp.eq.f32.partialorder %v301_v28, 1.0  ;;  %v321_v30 = vsel %vm313_vm2, 1, %v762_v0  ;;  %v323_v31 = vsel %vm315_vm3, 1, %v762_v0 }
  0x8b   : > { %v368_v32 = vadd.s32 %v366_v26, %v358_v29  ;;  %v325_v33 = vsel %vm317_vm5, 1, %v762_v0  ;;  %v327_v34 = vsel %vm319_vm6, 1, %v762_v0  ;;  %vm331_vm7 = vcmp.eq.f32.partialorder %v297_v25, 0.0 }
  0x8c   : > { %vm333_vm8 = vcmp.eq.f32.partialorder %v299_v27, 0.0  ;;  %vm335_vm11 = vcmp.eq.f32.partialorder %v301_v28, 0.0  ;;  %v337_v35 = vsel %vm329_vm4, 1, %v762_v0  ;;  %v339_v36 = vsel %vm331_vm7, 1, %v762_v0 }
  0x8d   : > { %370 = vst.msk [vmem:[%s959_s15] sm:$0xff] %vm228_vm0, %v368_v32  ;;  %v341_v37 = vsel %vm333_vm8, 1, %v762_v0  ;;  %v343_v38 = vsel %vm335_vm11, 1, %v762_v0  ;;  %v345_v39 = vsel %vm305_vm9, %v321_v30, %v337_v35  ;;  %v347_v40 = vsel %vm307_vm10, %v323_v31, %v339_v36 }
  0x8e   : > { %v349_v41 = vsel %vm309_vm15, %v325_v33, %v341_v37  ;;  %v351_v42 = vsel %vm311_vm1, %v327_v34, %v343_v38  ;;  %v359_v43 = vsel %vm228_vm0, %v345_v39, 0  ;;  %v360_v44 = vsel %vm228_vm0, %v347_v40, 0 }
  0x8f   : > { %v361_v0 = vsel %vm228_vm0, %v349_v41, 0  ;;  %v363_v45 = vsel %vm228_vm0, %v351_v42, 0 }
  0x90   : > { %v362_v46 = vadd.s32 %v361_v0, %v359_v43  ;;  %v364_v47 = vadd.s32 %v363_v45, %v360_v44 }
  0x92   : > { %v365_v49 = vadd.s32 %v364_v47, %v362_v46 }
  0x94   : > { %v369_v50 = vadd.s32 %v367_v48, %v365_v49 }
  0x96   : > { %371 = vst.msk [vmem:[%s959_s15 + $0x8] sm:$0xff] %vm228_vm0, %v369_v50 }
  0x97   : > { %683 = shalt.err (!%p680_p11)
}
  0x98   : > { %s684_s6 = scalar_lea.hbm %s1036_s8, 256  ;;  %s688_s5 = scalar_lea.hbm %s1091_s2, 512 }
  0x99   : > { %p685_p1 = scmp.ne.s32.totalorder %s1036_s8, %s684_s6  ;;  %p689_p5 = scmp.lt.u32.totalorder %s1036_s8, %s1091_s2 }
  0x9a   : > { %p690_p4 = scmp.lt.u32.totalorder %s688_s5, %s684_s6  ;;  %p692_p0 = scmp.lt.u32.totalorder %s684_s6, %s1036_s8 }
  0x9b   : > { %p686_p6 = pnand %p685_p1, %p1102_p3 }
  0x9c   : > { %p691_p8 = por %p690_p4, %p689_p5 }
  0x9d   : > { %p687_p2 = pneg %p686_p6 }
  0x9e   : > { %p693_p12 = por %p692_p0, %p691_p8 }
  0xa0   : > { %p694_p13 = pnand %p693_p12, %p687_p2 }
  0xa2   : > { %697 = shalt.err (!%p694_p13)
}
  0xa3   : > { %s764_s3 = smov 128   ;;  %s765_s15 = smov 8  }
  0xa4   : > { %522 = dma.vmem_to_hbm [thread:$0]  (%p1102_p3), %s1038_s19, 256, %s1036_s8, %s373_s16, %s764_s3, %s764_s3, %s765_s15  }
  0xa5 PF: > { %s401_s21 = sand.u32 1, %s736_s9   ;;  %p1103_p7 = scmp.ne.s32.totalorder %s1097_s24, 0 }
  0xa6   : > { %p1104_p10 = scmp.ge.s32.totalorder %s756_s14, 2  ;;  %s402_s26 = scalar_lea.sflag [#allocation4], %s401_s21 }
  0xa8   : > { %p532_p9 = pnand %p1104_p10, %p1103_p7 }
  0xaa   : > { %731 = dma.done.wait (!%p532_p9), %s402_s26, 256  }
  0xab   : > { %733 = vsyncadd (!%p532_p9), %s402_s26, 4294967040  ;;  %s21_s14 = sadd.s32 1, %s756_s14   ;;  %s1105_s9 = smov %s740_s10 }
  0xac   : > { %p18_p11 = scmp.ge.s32.totalorder %s21_s14, 4   ;;  %s1106_s10 = smov %s744_s11 }
  0xad   : > { %s1107_s11 = smov %s837_s23  ;;  %s1108_s12 = smov %s752_s13 }
  0xae   : > { %s1109_s13 = smov %s1111_s17  ;;  %20 = sbr.rel (!%p18_p11) target bundleno = 8 (0x8), region = 90 }
  0xb5   :  { %407 = vsyncpa [#allocation3], 1 }
  0xb6   :  { %409 = vsyncpa [#allocation3 + $0x1], 1 }
  0xb7   :  { %410 = vsyncpa [#allocation6], 1 }
  0xb8   :  { %412 = vsyncpa [#allocation6 + $0x1], 1 }
  0xb9   :  { %413 = vsyncpa [#allocation4], 1 }
  0xba   :  { %415 = vsyncpa [#allocation4 + $0x1], 1 }

</bundles_post_ra>
